<compile_context>
chip_gen: v7x
topology: tpu7x:2x2x1
jax: 0.10.0
libtpu: 0.0.40
codegen_flags: <defaults>
</compile_context>

<pallas_src>
import jax
import jax.numpy as jnp
from jax.experimental import pallas as pl
from jax.experimental.pallas import tpu as pltpu

# ----------------------------------------------------------------------------
# "Module configuration" — deterministic, in-script.
# ----------------------------------------------------------------------------
ATTRIBUTES_TUPLE = ("x1", "x2", "x3", "x4")                 # input_dim = 4
FORMULA_LIST = (
    "x1 + x2",                                              # f0
    "sqrt(abs(x3)) * x4",                                   # f1
    "exp(x1) - log(abs(x2) + 1)",                           # f2
    "sin(x3) + cos(x4)",                                    # f3
)
FORMULA_SIGNS = ("+", "-", "+", "-")                        # output_dim = 4

INPUT_DIM = len(ATTRIBUTES_TUPLE)
OUTPUT_DIM = len(FORMULA_LIST)

LANE = 128                  # vreg lane width
SUB = 8                     # vreg sublane count (f32)
GROUP = SUB * LANE          # 1024 batch elements per (8,128) vreg


# ----------------------------------------------------------------------------
# Pallas kernel: unrolled linear + softmax + formula eval + weighted reduction.
# Every intermediate is a dense [ts, 128] f32 array (full vreg utilization).
# ----------------------------------------------------------------------------
def formula_layer_kernel(w_ref, b_ref, x_ref, o_ref):
    # x_ref: [D, ts, 128] f32 in VMEM — batch packed onto sublanes AND lanes.
    # w_ref: [D, F] f32 in SMEM (pre-transposed Linear weight); b_ref: [1, F].
    x1 = x_ref[0]                                            # [ts, 128]
    x2 = x_ref[1]
    x3 = x_ref[2]
    x4 = x_ref[3]

    # AttentionLayer logits — unrolled broadcast-MACs on the VPU, weights read
    # as scalars from SMEM.
    # TODO(synk): if bundle profiling shows the 4 VALU slots binding after the
    # sublane-packing fix, move this 4x4 linear onto the idle MXU (jnp.dot).
    def logit(j):
        return (x1 * w_ref[0, j] + x2 * w_ref[1, j]
                + x3 * w_ref[2, j] + x4 * w_ref[3, j] + b_ref[0, j])

    l0, l1, l2, l3 = logit(0), logit(1), logit(2), logit(3)

    # softmax over the 4 formula columns, unrolled (no cross-lane XLU work).
    m = jnp.maximum(jnp.maximum(l0, l1), jnp.maximum(l2, l3))
    e0 = jnp.exp(l0 - m)
    e1 = jnp.exp(l1 - m)
    e2 = jnp.exp(l2 - m)
    e3 = jnp.exp(l3 - m)
    inv_den = pl.reciprocal(e0 + e1 + e2 + e3)               # exact, EUP-served

    # Hard-coded formulas (FORMULA_LIST) with FORMULA_SIGNS applied.
    f0 = x1 + x2                                             # sign '+'
    f1 = -(jnp.sqrt(jnp.abs(x3)) * x4)                       # sign '-'
    f2 = jnp.exp(x1) - jnp.log(jnp.abs(x2) + 1.0)            # sign '+'
    f3 = -(jnp.sin(x3) + jnp.cos(x4))                        # sign '-'

    # weighted sum over formulas → dense [ts, 128] store (unmasked vst).
    o_ref[...] = (f0 * e0 + f1 * e1 + f2 * e2 + f3 * e3) * inv_den


def formula_layer_forward(x, w_t, b, *, ts_max=512):
    """x: [B, D] f32, w_t: [D, F] f32 (pre-transposed Linear weight), b: [1, F].

    Returns final_output of shape [B].
    """
    B, D = x.shape
    F = w_t.shape[1]
    assert D == INPUT_DIM and F == OUTPUT_DIM

    # Pad the batch only to one (8*128)-element group — NOT to a multiple of
    # the tile — and use a ceiling-divide grid; Pallas masks the partial last
    # block.  Zero padding is safe: every formula is finite at 0, all ops are
    # per-lane (no cross-lane reductions), and padded lanes are sliced away.
    b_pad = max(-(-B // GROUP) * GROUP, GROUP)
    rows = b_pad // LANE                      # multiple of 8 (sublane aligned)

    # Tile size in 128-lane rows.  Per step: x tile = 4*ts*128*4 B = 2 KiB*ts,
    # out tile = 0.5 KiB*ts, double-buffered, plus ~14 live [ts,128] f32
    # temporaries → ~12 KiB*ts live VMEM.  ts = 512 → 64K batch elems / ~6 MiB:
    # fits v5e's 16 MiB scoped default and is tiny on v7x's 64 MiB physical.
    ts_max = max(SUB, (ts_max // SUB) * SUB)
    ts = min(ts_max, rows)
    if pl.cdiv(rows, ts) < 2 and rows > SUB:
        # Keep >=2 grid steps so the "parallel" axis shards across v7x's 2 TCs.
        ts = ((rows + 1) // 2 + SUB - 1) // SUB * SUB
    grid = (pl.cdiv(rows, ts),)

    # Pad + transpose + (free) reshape → [D, rows, 128].
    # TODO(synk): ideally the producer emits x already as [D, B]; the transpose
    # here is one extra HBM relayout pass (XLA fuses it with the pad under jit).
    # (Optional v5e micro-opt: ship x as bf16 and upcast in-kernel to halve
    #  input HBM bytes; kept f32 here for exact parity with the module.)
    x_p = jnp.pad(x.astype(jnp.float32), ((0, b_pad - B), (0, 0)))  # [b_pad, D]
    x_t = x_p.T.reshape(D, rows, LANE)                              # [D, rows, 128]

    w32 = w_t.astype(jnp.float32)
    b2 = b.reshape(1, F).astype(jnp.float32)

    cost = pl.CostEstimate(
        flops=64 * b_pad,              # unrolled linear + softmax + formulas
        transcendentals=10 * b_pad,    # 5 exp + log + sin + cos + sqrt + recip
        bytes_accessed=4 * (D + 1) * b_pad,
    )

    out = pl.pallas_call(
        formula_layer_kernel,
        out_shape=jax.ShapeDtypeStruct((rows, LANE), jnp.float32),
        grid_spec=pl.GridSpec(
            grid=grid,
            in_specs=[
                pl.BlockSpec(memory_space=pltpu.MemorySpace.SMEM),   # w_t [D, F]
                pl.BlockSpec(memory_space=pltpu.MemorySpace.SMEM),   # b   [1, F]
                pl.BlockSpec((D, ts, LANE), lambda i: (0, i, 0)),    # x tile
            ],
            out_specs=pl.BlockSpec((ts, LANE), lambda i: (i, 0)),    # dense out
        ),
        compiler_params=pltpu.CompilerParams(
            dimension_semantics=("parallel",),   # megacore sharding on v7x
            vmem_limit_bytes=32 << 20,           # headroom for larger ts_max;
                                                 # <= physical VMEM on all gens
        ),
        cost_estimate=cost,
    )(w32, b2, x_t)

    return out.reshape(b_pad)[:B]                                    # [B]


# ----------------------------------------------------------------------------
# Pure-JAX reference (mirrors the PyTorch forward exactly).
# ----------------------------------------------------------------------------
def formula_layer_reference(x, w_t, b):
    logits = x @ w_t + b
    attn = jax.nn.softmax(logits, axis=1)
    a1, a2, a3, a4 = x[:, 0], x[:, 1], x[:, 2], x[:, 3]
    f0 = a1 + a2
    f1 = -(jnp.sqrt(jnp.abs(a3)) * a4)
    f2 = jnp.exp(a1) - jnp.log(jnp.abs(a2) + 1.0)
    f3 = -(jnp.sin(a3) + jnp.cos(a4))
    outputs = jnp.stack([f0, f1, f2, f3], axis=1)
    return jnp.sum(outputs * attn, axis=1)


if __name__ == "__main__":
    key = jax.random.PRNGKey(0)
    k_x, k_w, k_b = jax.random.split(key, 3)

    B = 8
    # Deterministic example inputs / parameters.
    x = jax.random.normal(k_x, (B, INPUT_DIM), dtype=jnp.float32)
    # nn.Linear(input_dim, out_dim).weight is [F, D]; we store it transposed.
    w_t = jax.random.normal(k_w, (INPUT_DIM, OUTPUT_DIM), dtype=jnp.float32) * 0.5
    b = jax.random.normal(k_b, (1, OUTPUT_DIM), dtype=jnp.float32) * 0.1

    fwd = jax.jit(formula_layer_forward, static_argnames=("ts_max",))
    out = fwd(x, w_t, b)
    out = jax.block_until_ready(out)

    ref = formula_layer_reference(x, w_t, b)
    assert out.shape == (B,), out.shape
    assert jnp.allclose(out, ref, atol=1e-4, rtol=1e-4), (out, ref)

    print("KERNEL_OK")
</pallas_src>

<mosaic_0001>
module attributes {stable_mosaic.version = 11 : i64} {
  func.func @formula_layer_kernel(%arg0: i32, %arg1: memref<4x4xf32, #tpu.memory_space<smem>>, %arg2: memref<1x4xf32, #tpu.memory_space<smem>>, %arg3: memref<4x8x128xf32, #tpu.memory_space<vmem>>, %arg4: memref<8x128xf32, #tpu.memory_space<vmem>>) attributes {dimension_semantics = [#tpu.dimension_semantics<parallel>], iteration_bounds = array<i64: 1>, scalar_prefetch = 0 : i64, scratch_operands = 0 : i64, tpu.core_type = #tpu.core_type<tc>, window_params = [{transform_indices = @transform_0, window_bounds = array<i64: 4, 4>}, {transform_indices = @transform_1, window_bounds = array<i64: 1, 4>}, {transform_indices = @transform_2, window_bounds = array<i64: 4, 8, 128>}, {transform_indices = @transform_3, window_bounds = array<i64: 8, 128>}]} {
    %c0 = arith.constant 0 : index
    %c0_0 = arith.constant 0 : index
    %c0_1 = arith.constant 0 : index
    %0 = vector.load %arg3[%c0, %c0_0, %c0_1] : memref<4x8x128xf32, #tpu.memory_space<vmem>>, vector<1x8x128xf32>
    %1 = vector.shape_cast %0 : vector<1x8x128xf32> to vector<8x128xf32>
    %c1 = arith.constant 1 : index
    %c0_2 = arith.constant 0 : index
    %c0_3 = arith.constant 0 : index
    %2 = vector.load %arg3[%c1, %c0_2, %c0_3] : memref<4x8x128xf32, #tpu.memory_space<vmem>>, vector<1x8x128xf32>
    %3 = vector.shape_cast %2 : vector<1x8x128xf32> to vector<8x128xf32>
    %c2 = arith.constant 2 : index
    %c0_4 = arith.constant 0 : index
    %c0_5 = arith.constant 0 : index
    %4 = vector.load %arg3[%c2, %c0_4, %c0_5] : memref<4x8x128xf32, #tpu.memory_space<vmem>>, vector<1x8x128xf32>
    %5 = vector.shape_cast %4 : vector<1x8x128xf32> to vector<8x128xf32>
    %c3 = arith.constant 3 : index
    %c0_6 = arith.constant 0 : index
    %c0_7 = arith.constant 0 : index
    %6 = vector.load %arg3[%c3, %c0_6, %c0_7] : memref<4x8x128xf32, #tpu.memory_space<vmem>>, vector<1x8x128xf32>
    %7 = vector.shape_cast %6 : vector<1x8x128xf32> to vector<8x128xf32>
    %c0_8 = arith.constant 0 : index
    %c0_9 = arith.constant 0 : index
    %8 = memref.load %arg1[%c0_8, %c0_9] : memref<4x4xf32, #tpu.memory_space<smem>>
    %9 = vector.broadcast %8 : f32 to vector<8x128xf32>
    %10 = arith.mulf %1, %9 : vector<8x128xf32>
    %c1_10 = arith.constant 1 : index
    %c0_11 = arith.constant 0 : index
    %11 = memref.load %arg1[%c1_10, %c0_11] : memref<4x4xf32, #tpu.memory_space<smem>>
    %12 = vector.broadcast %11 : f32 to vector<8x128xf32>
    %13 = arith.mulf %3, %12 : vector<8x128xf32>
    %14 = arith.addf %10, %13 : vector<8x128xf32>
    %c2_12 = arith.constant 2 : index
    %c0_13 = arith.constant 0 : index
    %15 = memref.load %arg1[%c2_12, %c0_13] : memref<4x4xf32, #tpu.memory_space<smem>>
    %16 = vector.broadcast %15 : f32 to vector<8x128xf32>
    %17 = arith.mulf %5, %16 : vector<8x128xf32>
    %18 = arith.addf %14, %17 : vector<8x128xf32>
    %c3_14 = arith.constant 3 : index
    %c0_15 = arith.constant 0 : index
    %19 = memref.load %arg1[%c3_14, %c0_15] : memref<4x4xf32, #tpu.memory_space<smem>>
    %20 = vector.broadcast %19 : f32 to vector<8x128xf32>
    %21 = arith.mulf %7, %20 : vector<8x128xf32>
    %22 = arith.addf %18, %21 : vector<8x128xf32>
    %c0_16 = arith.constant 0 : index
    %c0_17 = arith.constant 0 : index
    %23 = memref.load %arg2[%c0_16, %c0_17] : memref<1x4xf32, #tpu.memory_space<smem>>
    %24 = vector.broadcast %23 : f32 to vector<8x128xf32>
    %25 = arith.addf %22, %24 : vector<8x128xf32>
    %c0_18 = arith.constant 0 : index
    %c1_19 = arith.constant 1 : index
    %26 = memref.load %arg1[%c0_18, %c1_19] : memref<4x4xf32, #tpu.memory_space<smem>>
    %27 = vector.broadcast %26 : f32 to vector<8x128xf32>
    %28 = arith.mulf %1, %27 : vector<8x128xf32>
    %c1_20 = arith.constant 1 : index
    %c1_21 = arith.constant 1 : index
    %29 = memref.load %arg1[%c1_20, %c1_21] : memref<4x4xf32, #tpu.memory_space<smem>>
    %30 = vector.broadcast %29 : f32 to vector<8x128xf32>
    %31 = arith.mulf %3, %30 : vector<8x128xf32>
    %32 = arith.addf %28, %31 : vector<8x128xf32>
    %c2_22 = arith.constant 2 : index
    %c1_23 = arith.constant 1 : index
    %33 = memref.load %arg1[%c2_22, %c1_23] : memref<4x4xf32, #tpu.memory_space<smem>>
    %34 = vector.broadcast %33 : f32 to vector<8x128xf32>
    %35 = arith.mulf %5, %34 : vector<8x128xf32>
    %36 = arith.addf %32, %35 : vector<8x128xf32>
    %c3_24 = arith.constant 3 : index
    %c1_25 = arith.constant 1 : index
    %37 = memref.load %arg1[%c3_24, %c1_25] : memref<4x4xf32, #tpu.memory_space<smem>>
    %38 = vector.broadcast %37 : f32 to vector<8x128xf32>
    %39 = arith.mulf %7, %38 : vector<8x128xf32>
    %40 = arith.addf %36, %39 : vector<8x128xf32>
    %c0_26 = arith.constant 0 : index
    %c1_27 = arith.constant 1 : index
    %41 = memref.load %arg2[%c0_26, %c1_27] : memref<1x4xf32, #tpu.memory_space<smem>>
    %42 = vector.broadcast %41 : f32 to vector<8x128xf32>
    %43 = arith.addf %40, %42 : vector<8x128xf32>
    %c0_28 = arith.constant 0 : index
    %c2_29 = arith.constant 2 : index
    %44 = memref.load %arg1[%c0_28, %c2_29] : memref<4x4xf32, #tpu.memory_space<smem>>
    %45 = vector.broadcast %44 : f32 to vector<8x128xf32>
    %46 = arith.mulf %1, %45 : vector<8x128xf32>
    %c1_30 = arith.constant 1 : index
    %c2_31 = arith.constant 2 : index
    %47 = memref.load %arg1[%c1_30, %c2_31] : memref<4x4xf32, #tpu.memory_space<smem>>
    %48 = vector.broadcast %47 : f32 to vector<8x128xf32>
    %49 = arith.mulf %3, %48 : vector<8x128xf32>
    %50 = arith.addf %46, %49 : vector<8x128xf32>
    %c2_32 = arith.constant 2 : index
    %c2_33 = arith.constant 2 : index
    %51 = memref.load %arg1[%c2_32, %c2_33] : memref<4x4xf32, #tpu.memory_space<smem>>
    %52 = vector.broadcast %51 : f32 to vector<8x128xf32>
    %53 = arith.mulf %5, %52 : vector<8x128xf32>
    %54 = arith.addf %50, %53 : vector<8x128xf32>
    %c3_34 = arith.constant 3 : index
    %c2_35 = arith.constant 2 : index
    %55 = memref.load %arg1[%c3_34, %c2_35] : memref<4x4xf32, #tpu.memory_space<smem>>
    %56 = vector.broadcast %55 : f32 to vector<8x128xf32>
    %57 = arith.mulf %7, %56 : vector<8x128xf32>
    %58 = arith.addf %54, %57 : vector<8x128xf32>
    %c0_36 = arith.constant 0 : index
    %c2_37 = arith.constant 2 : index
    %59 = memref.load %arg2[%c0_36, %c2_37] : memref<1x4xf32, #tpu.memory_space<smem>>
    %60 = vector.broadcast %59 : f32 to vector<8x128xf32>
    %61 = arith.addf %58, %60 : vector<8x128xf32>
    %c0_38 = arith.constant 0 : index
    %c3_39 = arith.constant 3 : index
    %62 = memref.load %arg1[%c0_38, %c3_39] : memref<4x4xf32, #tpu.memory_space<smem>>
    %63 = vector.broadcast %62 : f32 to vector<8x128xf32>
    %64 = arith.mulf %1, %63 : vector<8x128xf32>
    %c1_40 = arith.constant 1 : index
    %c3_41 = arith.constant 3 : index
    %65 = memref.load %arg1[%c1_40, %c3_41] : memref<4x4xf32, #tpu.memory_space<smem>>
    %66 = vector.broadcast %65 : f32 to vector<8x128xf32>
    %67 = arith.mulf %3, %66 : vector<8x128xf32>
    %68 = arith.addf %64, %67 : vector<8x128xf32>
    %c2_42 = arith.constant 2 : index
    %c3_43 = arith.constant 3 : index
    %69 = memref.load %arg1[%c2_42, %c3_43] : memref<4x4xf32, #tpu.memory_space<smem>>
    %70 = vector.broadcast %69 : f32 to vector<8x128xf32>
    %71 = arith.mulf %5, %70 : vector<8x128xf32>
    %72 = arith.addf %68, %71 : vector<8x128xf32>
    %c3_44 = arith.constant 3 : index
    %c3_45 = arith.constant 3 : index
    %73 = memref.load %arg1[%c3_44, %c3_45] : memref<4x4xf32, #tpu.memory_space<smem>>
    %74 = vector.broadcast %73 : f32 to vector<8x128xf32>
    %75 = arith.mulf %7, %74 : vector<8x128xf32>
    %76 = arith.addf %72, %75 : vector<8x128xf32>
    %c0_46 = arith.constant 0 : index
    %c3_47 = arith.constant 3 : index
    %77 = memref.load %arg2[%c0_46, %c3_47] : memref<1x4xf32, #tpu.memory_space<smem>>
    %78 = vector.broadcast %77 : f32 to vector<8x128xf32>
    %79 = arith.addf %76, %78 : vector<8x128xf32>
    %80 = arith.maximumf %25, %43 : vector<8x128xf32>
    %81 = arith.maximumf %61, %79 : vector<8x128xf32>
    %82 = arith.maximumf %80, %81 : vector<8x128xf32>
    %83 = arith.subf %25, %82 : vector<8x128xf32>
    %84 = math.exp %83 : vector<8x128xf32>
    %85 = arith.subf %43, %82 : vector<8x128xf32>
    %86 = math.exp %85 : vector<8x128xf32>
    %87 = arith.subf %61, %82 : vector<8x128xf32>
    %88 = math.exp %87 : vector<8x128xf32>
    %89 = arith.subf %79, %82 : vector<8x128xf32>
    %90 = math.exp %89 : vector<8x128xf32>
    %91 = arith.addf %84, %86 : vector<8x128xf32>
    %92 = arith.addf %91, %88 : vector<8x128xf32>
    %93 = arith.addf %92, %90 : vector<8x128xf32>
    %94 = tpu.reciprocal %93 : vector<8x128xf32> -> vector<8x128xf32>
    %95 = arith.addf %1, %3 : vector<8x128xf32>
    %96 = math.absf %5 : vector<8x128xf32>
    %97 = math.sqrt %96 : vector<8x128xf32>
    %98 = arith.mulf %97, %7 : vector<8x128xf32>
    %cst = arith.constant 0.000000e+00 : f32
    %99 = vector.broadcast %cst : f32 to vector<8x128xf32>
    %100 = arith.subf %99, %98 : vector<8x128xf32>
    %101 = math.exp %1 : vector<8x128xf32>
    %102 = math.absf %3 : vector<8x128xf32>
    %cst_48 = arith.constant 1.000000e+00 : f32
    %103 = vector.broadcast %cst_48 : f32 to vector<8x128xf32>
    %104 = arith.addf %102, %103 : vector<8x128xf32>
    %105 = math.log %104 : vector<8x128xf32>
    %106 = arith.subf %101, %105 : vector<8x128xf32>
    %107 = math.sin %5 : vector<8x128xf32>
    %108 = math.cos %7 : vector<8x128xf32>
    %109 = arith.addf %107, %108 : vector<8x128xf32>
    %cst_49 = arith.constant 0.000000e+00 : f32
    %110 = vector.broadcast %cst_49 : f32 to vector<8x128xf32>
    %111 = arith.subf %110, %109 : vector<8x128xf32>
    %112 = arith.mulf %95, %84 : vector<8x128xf32>
    %113 = arith.mulf %100, %86 : vector<8x128xf32>
    %114 = arith.addf %112, %113 : vector<8x128xf32>
    %115 = arith.mulf %106, %88 : vector<8x128xf32>
    %116 = arith.addf %114, %115 : vector<8x128xf32>
    %117 = arith.mulf %111, %90 : vector<8x128xf32>
    %118 = arith.addf %116, %117 : vector<8x128xf32>
    %119 = arith.mulf %118, %94 : vector<8x128xf32>
    %c0_50 = arith.constant 0 : index
    %c0_51 = arith.constant 0 : index
    %120 = vector.load %arg4[%c0_50, %c0_51] : memref<8x128xf32, #tpu.memory_space<vmem>>, vector<8x128xf32>
    tpu.vector_store %arg4[%c0_50, %c0_51], %119 {strides = array<i32>} : memref<8x128xf32, #tpu.memory_space<vmem>>, vector<8x128xf32>,
    return
  }
  func.func @transform_0(%arg0: i32) -> (i32, i32) {
    %c0_i32 = arith.constant 0 : i32
    %c0_i32_0 = arith.constant 0 : i32
    %c0_i32_1 = arith.constant 0 : i32
    return %c0_i32, %c0_i32_0 : i32, i32
  }
  func.func @transform_1(%arg0: i32) -> (i32, i32) {
    %c0_i32 = arith.constant 0 : i32
    %c0_i32_0 = arith.constant 0 : i32
    %c0_i32_1 = arith.constant 0 : i32
    return %c0_i32, %c0_i32_0 : i32, i32
  }
  func.func @transform_2(%arg0: i32) -> (i32, i32, i32) {
    %c0_i32 = arith.constant 0 : i32
    %c0_i32_0 = arith.constant 0 : i32
    %c0_i32_1 = arith.constant 0 : i32
    return %c0_i32, %arg0, %c0_i32_0 : i32, i32, i32
  }
  func.func @transform_3(%arg0: i32) -> (i32, i32) {
    %c0_i32 = arith.constant 0 : i32
    %c0_i32_0 = arith.constant 0 : i32
    return %arg0, %c0_i32 : i32, i32
  }
}

</mosaic_0001>

<bundles_post_ra>
// kernel: formula_layer_forward.1
= control target key start
LH: loop header
LB: loop body
LE: loop exit
PB: predicated region body
PF: predicated region fallthrough
CT: control target
= control target key end

     0   :  { %8 = vsyncpa [#allocation3], 0  ;;  %s742_s0 = inlined_call_operand.vmem [shape: f32[4,4], index: 0, kind: input, shape index: {}]   ;;  %s743_s1 = inlined_call_operand.vmem [shape: f32[1,4], index: 1, kind: input, shape index: {}]   ;;  %s744_s2 = inlined_call_operand.vmem [shape: f32[4,8,128], index: 2, kind: input, shape index: {}]   ;;  %s745_s3 = inlined_call_operand.vmem [shape: f32[8,128], index: 3, kind: output, shape index: {}]  }
   0x1   :  { %s16_s14 = sshll.u32 %s742_s0, 4  ;;  %s17_s14 = int_to_ptr.vmem [resolvable:$true] %s16_s14 }
   0x2   :  { %9 = vsyncpa [#allocation5], 0  ;;  %s26_s17 = sshll.u32 %s743_s1, 4  ;;  %s448_s18 = scalar_lea.vmem %s17_s14, 64  ;;  %s27_s17 = int_to_ptr.vmem [resolvable:$true] %s26_s17 }
   0x3   :  { %p449_p0 = scmp.ne.s32.totalorder %s17_s14, %s448_s18  ;;  %p453_p1 = scmp.lt.s32.totalorder %s17_s14, %s17_s14 }
   0x4   :  { %p454_p2 = scmp.lt.s32.totalorder %s448_s18, %s448_s18 }
   0x6   :  { %p455_p3 = por %p454_p2, %p453_p1 }
   0x8   :  { %p456_p4 = pnand %p455_p3, %p449_p0 }
   0xa   :  { %459 = shalt.err (!%p456_p4)
}
   0xb   :  { %s476_s19 = smov [#allocation2]   ;;  %s460_s20 = scalar_lea.vmem %s27_s17, 16 }
   0xc   :  { %19 = dma.vmem_to_smem %s17_s14, 64, %s476_s19, [#allocation3]  }
   0xd   :  { %p461_p5 = scmp.ne.s32.totalorder %s27_s17, %s460_s20  ;;  %p465_p6 = scmp.lt.s32.totalorder %s27_s17, %s27_s17 }
   0xe   :  { %p466_p7 = scmp.lt.s32.totalorder %s460_s20, %s460_s20 }
  0x10   :  { %p467_p8 = por %p466_p7, %p465_p6 }
  0x12   :  { %p468_p9 = pnand %p467_p8, %p461_p5 }
  0x14   :  { %471 = shalt.err (!%p468_p9)
}
  0x15   :  { %s477_s0 = smov [#allocation4]  }
  0x16   :  { %29 = dma.vmem_to_smem %s27_s17, 16, %s477_s0, [#allocation5]  }
  0x17   :  { %472 = dma.done.wait [#allocation3], 64  }
  0x18   :  { %473 = vsyncadd [#allocation3], 4294967232 }
  0x19   :  { %474 = dma.done.wait [#allocation5], 16  }
  0x1a   :  { %475 = vsyncadd [#allocation5], 4294967280 }
  0x1b   :  { %38 = sfence }
  0x1c   :  { %v513_v0 = vld [vmem:[%s744_s2 + $0x10] sm:$0xff]  ;;  %s46_s22 = sld [smem:[#allocation2]]  ;;  %s385_s26 = sld [smem:[#allocation2 + $0x1]]  ;;  %v521_v3 = vld [vmem:[%s744_s2] sm:$0xff]  ;;  %v526_v4 = vld [vmem:[%s744_s2 + $0x8] sm:$0xff] }
  0x1d   :  { %s382_s23 = sld [smem:[#allocation2 + $0x80]]  ;;  %v158_v1 = vand.u32 2139095040, %v513_v0  ;;  %s386_s27 = sld [smem:[#allocation2 + $0x81]]  ;;  %v533_v13 = vand.u32 2147483647, %v513_v0  ;;  %v543_v17 = vld [vmem:[%s744_s2 + $0x18] sm:$0xff] }
  0x1e   :  { %s383_s24 = sld [smem:[#allocation2 + $0x100]]  ;;  %s516_s28 = sld [smem:[#allocation2 + $0x101]]  ;;  %v478_v27 = vmov 683565275   ;;  %v479_v29 = vmov 2475754826  }
  0x1f   :  { %s384_s25 = sld [smem:[#allocation2 + $0x180]]  ;;  %v159_v2 = vshrl.u32 %v158_v1, 23  ;;  %s530_s6 = sld [smem:[#allocation2 + $0x181]]  ;;  %v162_v24 = vand.u32 8388607, %v533_v13  ;;  %v262_v39 = vand.u32 2139095040, %v543_v17  ;;  %424 = vrsqrt.f32 %v533_v13 }
  0x20   :  { %s538_s7 = sld [smem:[#allocation2 + $0x2]]  ;;  %v480_v33 = vmov 2131351028   ;;  %v481_v37 = vmov 2102212464   ;;  %s580_s12 = sld [smem:[#allocation2 + $0x3]] }
  0x21   :  { %v400_v7 = vadd.s32 4294967169, %v159_v2  ;;  %s551_s10 = sld [smem:[#allocation2 + $0x82]]  ;;  %v163_v41 = vor.u32 8388608, %v162_v24  ;;  %v482_v43 = vmov 920167782   ;;  %v263_v55 = vshrl.u32 %v262_v39, 23 }
  0x22   :  { %v47_v5 = vstv %s46_s22  ;;  %v65_v15 = vstv %s385_s26  ;;  %s564_s2 = sld [smem:[#allocation2 + $0x102]]  ;;  %v483_v51 = vmov 1326507024   ;;  %s582_s13 = sld [smem:[#allocation2 + $0x83]]  ;;  %vm157_vm13 = vcmp.lt.s32.totalorder %v513_v0, 0 }
  0x23   :  { %v50_v6 = vstv %s382_s23  ;;  %v165_v9 = vadd.s32 1, %v400_v7  ;;  %v48_v10 = vmul.f32 %v47_v5, %v521_v3  ;;  %v68_v18 = vstv %s386_s27  ;;  %s578_s11 = sld [smem:[#allocation2 + $0x182]]  ;;  %s586_s14 = sld [smem:[#allocation2 + $0x103]] }
  0x24   :  { %v54_v8 = vstv %s383_s24  ;;  %v51_v11 = vmul.f32 %v526_v4, %v50_v6  ;;  %v72_v22 = vstv %s516_s28  ;;  %v554_v23 = vmul.f32 %v65_v15, %v521_v3  ;;  %s636_s15 = sld [smem:[#allocation2 + $0x183]]  ;;  %s646_s16 = sld [smem:[#allocation4]] }
  0x25   :  { %v58_v12 = vstv %s384_s25  ;;  %vm166_vm0 = vcmp.gt.s32.totalorder %v165_v9, 0  ;;  %v536_v14 = vmul.f32 %v513_v0, %v54_v8  ;;  %v69_v26 = vmul.f32 %v526_v4, %v68_v18  ;;  %s650_s17 = sld [smem:[#allocation4 + $0x1]]  ;;  %s653_s18 = sld [smem:[#allocation4 + $0x2]] }
  0x26   :  { %v167_v16 = vsel %vm166_vm0, %v165_v9, 0  ;;  %v545_v20 = vadd.f32 %v51_v11, %v48_v10  ;;  %v548_v21 = vmul.f32 %v543_v17, %v58_v12  ;;  %v561_v31 = vmul.f32 %v513_v0, %v72_v22  ;;  %s662_s19 = sld [smem:[#allocation4 + $0x3]] }
  0x27   :  { %v169_v19 = vand.u32 31, %v167_v16  ;;  %v168_v32 = vshrl.u32 %v167_v16, 5  ;;  %v76_v40 = vstv %s530_s6  ;;  %v83_v49 = vstv %s538_s7 }
  0x28   :  { %v86_v53 = vstv %s551_s10  ;;  %v203_v57 = vshll.u32 %v163_v41, 8  ;;  %v90_v5 = vstv %s564_s2  ;;  %v404_v8 = vadd.s32 4294967169, %v263_v55 }
  0x29   :  { %v170_v25 = vsub.s32 32, %v169_v19  ;;  %v172_v28 = vshll.u32 %v478_v27, %v169_v19  ;;  %v175_v30 = vshll.u32 %v479_v29, %v169_v19  ;;  %v178_v34 = vshll.u32 %v480_v33, %v169_v19 }
  0x2a   :  { %v181_v38 = vshll.u32 %v481_v37, %v169_v19  ;;  %v184_v44 = vshll.u32 %v482_v43, %v169_v19  ;;  %vm187_vm1 = vcmp.lt.s32.totalorder %v168_v32, 1  ;;  %vm189_vm2 = vcmp.lt.s32.totalorder %v168_v32, 3 }
  0x2b   :  { %v173_v35 = vshrl.u32 %v479_v29, %v170_v25  ;;  %v176_v36 = vshrl.u32 %v480_v33, %v170_v25  ;;  %v179_v42 = vshrl.u32 %v481_v37, %v170_v25  ;;  %v171_v45 = vshrl.u32 %v478_v27, %v170_v25 }
  0x2c   :  { %v182_v48 = vshrl.u32 %v482_v43, %v170_v25  ;;  %v185_v52 = vshrl.u32 %v483_v51, %v170_v25  ;;  %vm188_vm3 = vcmp.lt.s32.totalorder %v168_v32, 2  ;;  %vm190_vm4 = vcmp.lt.s32.totalorder %v168_v32, 4 }
  0x2d   :  { %v174_v46 = vor.u32 %v173_v35, %v172_v28  ;;  %v177_v47 = vor.u32 %v176_v36, %v175_v30  ;;  %v180_v50 = vor.u32 %v179_v42, %v178_v34  ;;  %v259_v18 = vand.u32 2147483647, %v543_v17 }
  0x2e   :  { %v183_v54 = vor.u32 %v182_v48, %v181_v38  ;;  %v186_v56 = vor.u32 %v185_v52, %v184_v44  ;;  %v269_v19 = vadd.s32 1, %v404_v8  ;;  %v606_v22 = vadd.f32 %v536_v14, %v545_v20 }
  0x2f   :  { %v191_v58 = vsel %vm187_vm1, %v171_v45, %v174_v46  ;;  %v192_v59 = vsel %vm190_vm4, %v180_v50, 2102212464  ;;  %v195_v60 = vsel %vm187_vm1, %v174_v46, %v177_v47  ;;  %v199_v1 = vsel %vm187_vm1, %v177_v47, %v180_v50 }
  0x30   :  { %v196_v61 = vsel %vm190_vm4, %v183_v54, 920167782  ;;  %v193_v62 = vsel %vm189_vm2, %v177_v47, %v192_v59  ;;  %v200_v2 = vsel %vm190_vm4, %v186_v56, 1326507024  ;;  %v609_v24 = vadd.f32 %v69_v26, %v554_v23 }
  0x31   :  { %v197_v63 = vsel %vm189_vm2, %v180_v50, %v196_v61  ;;  %v201_v7 = vsel %vm189_vm2, %v183_v54, %v200_v2  ;;  %v194_v9 = vsel %vm188_vm3, %v191_v58, %v193_v62  ;;  %v612_v25 = vmul.f32 %v543_v17, %v76_v40 }
  0x32   :  { %v198_v6 = vsel %vm188_vm3, %v195_v60, %v197_v63  ;;  %v202_v10 = vsel %vm188_vm3, %v199_v1, %v201_v7  ;;  %v84_v28 = vmul.f32 %v83_v49, %v521_v3  ;;  %v94_v30 = vstv %s578_s11 }
  0x33   :  { %v596_v11 = vmul.u32.u64.low %v203_v57, %v198_v6  ;;  %v597_v12 = vmul.u32.u64.high %v203_v57, %v198_v6, %v596_v11  ;;  %v600_v15 = vmul.u32.u64.low %v203_v57, %v202_v10  ;;  %v601_v16 = vmul.u32.u64.high %v203_v57, %v202_v10, %v600_v15 }
  0x34   :  { %v101_v32 = vstv %s580_s12  ;;  %v210_v34 = vmul.u32 %v203_v57, %v194_v9  ;;  %vm270_vm5 = vcmp.gt.s32.totalorder %v269_v19, 0  ;;  %v87_v35 = vmul.f32 %v526_v4, %v86_v53 }
  0x35   :  { %v619_v36 = vmul.f32 %v513_v0, %v90_v5  ;;  %v213_v14 = vadd.s32 1, %v597_v12  ;;  %v271_v20 = vsel %vm270_vm5, %v269_v19, 0  ;;  %v104_v23 = vstv %s582_s13 }
  0x36   :  { %vm212_vm6 = vc.u32 %v601_v16, %v596_v11  ;;  %v266_v26 = vand.u32 8388607, %v259_v18  ;;  %v273_v38 = vand.u32 31, %v271_v20  ;;  %v102_v39 = vmul.f32 %v101_v32, %v521_v3 }
  0x37   :  { %v108_v40 = vstv %s586_s14  ;;  %v214_v41 = vsel %vm212_vm6, %v213_v14, %v597_v12  ;;  %v272_v42 = vshrl.u32 %v271_v20, 5  ;;  %v105_v48 = vmul.f32 %v526_v4, %v104_v23 }
  0x38   :  { %v215_v44 = vadd.s32 %v214_v41, %v210_v34  ;;  %v274_v45 = vsub.s32 32, %v273_v38  ;;  %v276_v46 = vshll.u32 %v478_v27, %v273_v38  ;;  %v279_v47 = vshll.u32 %v479_v29, %v273_v38 }
  0x39   :  { %v282_v49 = vshll.u32 %v480_v33, %v273_v38  ;;  %v285_v50 = vshll.u32 %v481_v37, %v273_v38  ;;  %v288_v52 = vshll.u32 %v482_v43, %v273_v38  ;;  %v267_v54 = vor.u32 8388608, %v266_v26 }
  0x3a   :  { %v216_v53 = vadd.s32 536870912, %v215_v44  ;;  %v277_v55 = vshrl.u32 %v479_v29, %v274_v45  ;;  %v280_v56 = vshrl.u32 %v480_v33, %v274_v45  ;;  %v275_v57 = vshrl.u32 %v478_v27, %v274_v45 }
  0x3b   :  { %v283_v58 = vshrl.u32 %v481_v37, %v274_v45  ;;  %v286_v59 = vshrl.u32 %v482_v43, %v274_v45  ;;  %v289_v60 = vshrl.u32 %v483_v51, %v274_v45  ;;  %vm291_vm7 = vcmp.lt.s32.totalorder %v272_v42, 1 }
  0x3c   :  { %v644_v61 = vshrl.u32 %v216_v53, 30  ;;  %v278_v62 = vor.u32 %v277_v55, %v276_v46  ;;  %v281_v63 = vor.u32 %v280_v56, %v279_v47  ;;  %v88_v1 = vadd.f32 %v87_v35, %v84_v28 }
  0x3d   :  { %v284_v2 = vor.u32 %v283_v58, %v282_v49  ;;  %v287_v5 = vor.u32 %v286_v59, %v285_v50  ;;  %v290_v6 = vor.u32 %v289_v60, %v288_v52  ;;  %v106_v29 = vadd.f32 %v105_v48, %v102_v39 }
  0x3e   :  { %v109_v27 = vmul.f32 %v513_v0, %v108_v40  ;;  %v218_v33 = vshll.u32 %v644_v61, 30  ;;  %vm293_vm8 = vcmp.lt.s32.totalorder %v272_v42, 3  ;;  %vm292_vm9 = vcmp.lt.s32.totalorder %v272_v42, 2 }
  0x3f   :  { %vm294_vm10 = vcmp.lt.s32.totalorder %v272_v42, 4  ;;  %v299_v37 = vsel %vm291_vm7, %v278_v62, %v281_v63  ;;  %v307_v43 = vshll.u32 %v267_v54, 8  ;;  %v295_v7 = vsel %vm291_vm7, %v275_v57, %v278_v62 }
  0x40   :  { %v219_v51 = vsub.s32 %v215_v44, %v218_v33  ;;  %v296_v8 = vsel %vm294_vm10, %v284_v2, 2102212464  ;;  %v300_v9 = vsel %vm294_vm10, %v287_v5, 920167782  ;;  %v303_v15 = vsel %vm291_vm7, %v281_v63, %v284_v2 }
  0x41   :  { %v297_v10 = vsel %vm293_vm8, %v281_v63, %v296_v8  ;;  %v301_v12 = vsel %vm293_vm8, %v284_v2, %v300_v9  ;;  %v304_v19 = vsel %vm294_vm10, %v290_v6, 1326507024  ;;  %v74_v28 = vadd.f32 %v561_v31, %v609_v24 }
  0x42   :  { %v112_v32 = vstv %s636_s15  ;;  %v221_v34 = vsub.s32 0, %v219_v51  ;;  %v302_v35 = vsel %vm292_vm9, %v299_v37, %v301_v12  ;;  %v95_v14 = vmul.f32 %v543_v17, %v94_v30 }
  0x43   :  { %v305_v20 = vsel %vm293_vm8, %v287_v5, %v304_v19  ;;  %v669_v23 = vmul.u32.u64.low %v307_v43, %v302_v35  ;;  %v670_v26 = vmul.u32.u64.high %v307_v43, %v302_v35, %v669_v23  ;;  %v92_v38 = vadd.f32 %v619_v36, %v88_v1 }
  0x44   :  { %v401_v31 = vmin.u32 %v221_v34, %v219_v51  ;;  %v298_v24 = vsel %vm292_vm9, %v295_v7, %v297_v10  ;;  %v306_v39 = vsel %vm292_vm9, %v303_v15, %v305_v20  ;;  %v110_v40 = vadd.f32 %v109_v27, %v106_v29 }
  0x45   :  { %v113_v41 = vmul.f32 %v543_v17, %v112_v32  ;;  %v676_v44 = vmul.u32.u64.low %v307_v43, %v306_v39  ;;  %v677_v45 = vmul.u32.u64.high %v307_v43, %v306_v39, %v676_v44  ;;  %v62_v46 = vstv %s646_s16 }
  0x46   :  { %v223_v30 = vclz %v401_v31  ;;  %v314_v47 = vmul.u32 %v307_v43, %v298_v24  ;;  %v317_v48 = vadd.s32 1, %v670_v26  ;;  %v60_v36 = vadd.f32 %v548_v21, %v606_v22 }
  0x47   :  { %v80_v49 = vstv %s650_s17  ;;  %v98_v50 = vstv %s653_s18  ;;  %v78_v42 = vadd.f32 %v612_v25, %v74_v28  ;;  %v96_v53 = vadd.f32 %v95_v14, %v92_v38 }
  0x48   :  { %v402_v52 = vadd.s32 4294967294, %v223_v30  ;;  %v114_v54 = vadd.f32 %v113_v41, %v110_v40  ;;  %vm316_vm11 = vc.u32 %v677_v45, %v669_v23  ;;  %v116_v55 = vstv %s662_s19 }
  0x49   :  { %v211_v56 = vadd.s32 %v596_v11, %v601_v16  ;;  %v318_v57 = vsel %vm316_vm11, %v317_v48, %v670_v26  ;;  %v63_v60 = vadd.f32 %v62_v46, %v60_v36  ;;  %v81_v63 = vadd.f32 %v80_v49, %v78_v42 }
  0x4a   :  { %vm403_vm12 = vcmp.lt.s32.totalorder %v402_v52, 0  ;;  %v319_v59 = vadd.s32 %v318_v57, %v314_v47  ;;  %v99_v1 = vadd.f32 %v98_v50, %v96_v53  ;;  %v117_v25 = vadd.f32 %v116_v55, %v114_v54 }
  0x4b   :  { %v226_v58 = vsel %vm403_vm12, 0, %v402_v52  ;;  %v118_v11 = vmax.f32 %v63_v60, %v81_v63  ;;  %v315_v26 = vadd.s32 %v669_v23, %v677_v45  ;;  %vm156_vm15 = vcmp.le.f32.partialorder %v533_v13, 0.7853982  ;;  %v425_v52 = vpop.eup %424 }
  0x4c   :  { %v227_v21 = vsub.s32 32, %v226_v58  ;;  %v228_v22 = vshll.u32 %v219_v51, %v226_v58  ;;  %v231_v62 = vsub.s32 4294967266, %v226_v58  ;;  %v320_v2 = vadd.s32 536870912, %v319_v59 }
  0x4d   :  { %v119_v16 = vmax.f32 %v99_v1, %v117_v25  ;;  %v150_v30 = vand.u32 2147483647, %v526_v4  ;;  %v241_v23 = vsub.s32 4, %v644_v61  ;;  %v140_v57 = vmul.f32 %v425_v52, %v533_v13 }
  0x4e   :  { %v229_v5 = vshrl.u32 %v211_v56, %v227_v21  ;;  %v232_v6 = vadd.s32 127, %v231_v62  ;;  %v691_v29 = vshrl.u32 %v320_v2, 30  ;;  %v148_v58 = vmul.f32 1.442695, %v521_v3 }
  0x4f   :  { %v120_v51 = vmax.f32 %v118_v11, %v119_v16  ;;  %v151_v50 = vadd.f32 1.0, %v150_v30  ;;  %v242_v55 = vsel %vm157_vm13, %v241_v23, %v644_v61  ;;  %vm141_vm0 = vcmp.eq.f32.partialorder %v533_v13, inf }
  0x50   :  { %v230_v27 = vor.u32 %v229_v5, %v228_v22  ;;  %v233_v33 = vshll.u32 %v232_v6, 23  ;;  %v322_v37 = vshll.u32 %v691_v29, 30  ;;  %vm261_vm1 = vcmp.lt.s32.totalorder %v543_v17, 0 }
  0x51   :  { %v121_v19 = vsub.f32 %v63_v60, %v120_v51  ;;  %v124_v32 = vsub.f32 %v81_v63, %v120_v51  ;;  %v127_v14 = vsub.f32 %v99_v1, %v120_v51  ;;  %v130_v48 = vsub.f32 %v117_v25, %v120_v51 }
  0x52   :  { %v234_v43 = vor.u32 4788187, %v233_v33  ;;  %v237_v7 = vcvt.s32.f32 %v230_v27  ;;  %v323_v8 = vsub.s32 %v319_v59, %v322_v37  ;;  %v244_v59 = vsel %vm156_vm15, 0, %v242_v55 }
  0x53   :  { %v122_v20 = vmul.f32 1.442695, %v121_v19  ;;  %v125_v38 = vmul.f32 1.442695, %v124_v32  ;;  %v128_v44 = vmul.f32 1.442695, %v127_v14  ;;  %v142_v25 = vsel %vm141_vm0, %v533_v13, %v140_v57 }
  0x54   :  { %v235_v9 = vand.u32 2147483647, %v234_v43  ;;  %v325_v10 = vsub.s32 0, %v323_v8  ;;  %v131_v54 = vmul.f32 1.442695, %v130_v48  ;;  %v144_v22 = vand.u32 2147483648, %v533_v13 }
  0x55   :  { %426 = vpow2.f32 %v122_v20  ;;  %vm717_vm2 = vcmp.le.f32.partialorder %v259_v18, 0.7853982  ;;  %v345_v63 = vsub.s32 4, %v691_v29  ;;  %vm143_vm3 = vcmp.eq.f32.partialorder %v533_v13, 0.0 }
  0x56   :  { %v238_v12 = vmul.f32 %v237_v7, %v235_v9  ;;  %v405_v15 = vmin.u32 %v325_v10, %v323_v8  ;;  %428 = vpow2.f32 %v125_v38  ;;  %v248_v2 = vadd.s32 3, %v244_v59 }
  0x57   :  { %430 = vpow2.f32 %v128_v44  ;;  %v145_v11 = vsel %vm143_vm3, %v144_v22, %v142_v25  ;;  %v346_v16 = vsel %vm261_vm1, %v345_v63, %v691_v29  ;;  %vm247_vm7 = vweird.f32 %v513_v0 }
  0x58   :  { %v327_v28 = vclz %v405_v15  ;;  %v239_v34 = vxor.u32 2147483648, %v238_v12  ;;  %v249_v13 = vand.u32 3, %v248_v2  ;;  %v146_v7 = vmul.f32 %v543_v17, %v145_v11 }
  0x59   :  { %v137_v15 = vadd.f32 %v526_v4, %v521_v3  ;;  %vm351_vm11 = vweird.f32 %v543_v17 }
  0x5a   :  { %v406_v35 = vadd.s32 4294967294, %v327_v28  ;;  %v240_v24 = vsel %vm157_vm13, %v239_v34, %v238_v12  ;;  %vm251_vm4 = vcmp.eq.s32.totalorder %v249_v13, 0  ;;  %vm254_vm5 = vcmp.eq.s32.totalorder %v249_v13, 2 }
  0x5b   :  { %v243_v45 = vsel %vm156_vm15, %v513_v0, %v240_v24  ;;  %v147_v32 = vsub.f32 0.0, %v146_v7  ;;  %vm250_vm6 = vcmp.lt.s32.totalorder %v249_v13, 2 }
  0x5c   :  { %vm407_vm14 = vcmp.lt.s32.totalorder %v406_v35, 0  ;;  %432 = vcosq.f32 %v243_v45 }
  0x5d   :  { %v330_v31 = vsel %vm407_vm14, 0, %v406_v35  ;;  %434 = vsinq.f32 %v243_v45 }
  0x5e   :  { %v331_v39 = vsub.s32 32, %v330_v31  ;;  %v332_v40 = vshll.u32 %v323_v8, %v330_v31  ;;  %v335_v41 = vsub.s32 4294967266, %v330_v31  ;;  %436 = vlog2.f32 %v151_v50 }
  0x5f   :  { %438 = vpow2.f32 %v131_v54  ;;  %v427_v21 = vpop.eup %426  ;;  %v348_v8 = vsel %vm717_vm2, 0, %v346_v16 }
  0x60   :  { %v333_v46 = vshrl.u32 %v315_v26, %v331_v39  ;;  %v336_v47 = vadd.s32 127, %v335_v41  ;;  %v429_v1 = vpop.eup %428  ;;  %440 = vpow2.f32 %v148_v58  ;;  %v352_v19 = vand.u32 3, %v348_v8 }
  0x61   :  { %v431_v6 = vpop.eup %430  ;;  %v133_v33 = vadd.f32 %v429_v1, %v427_v21  ;;  %v364_v38 = vmul.f32 %v427_v21, %v137_v15 }
  0x62   :  { %v334_v36 = vor.u32 %v333_v46, %v332_v40  ;;  %v337_v49 = vshll.u32 %v336_v47, 23  ;;  %vm357_vm8 = vcmp.eq.s32.totalorder %v352_v19, 2  ;;  %vm354_vm9 = vcmp.eq.s32.totalorder %v352_v19, 0 }
  0x63   :  { %v134_v9 = vadd.f32 %v431_v6, %v133_v33  ;;  %v365_v40 = vmul.f32 %v429_v1, %v147_v32  ;;  %vm353_vm10 = vcmp.lt.s32.totalorder %v352_v19, 2 }
  0x64   :  { %v338_v42 = vor.u32 4788187, %v337_v49  ;;  %v341_v53 = vcvt.s32.f32 %v334_v36 }
  0x65   :  { %v366_v46 = vadd.f32 %v365_v40, %v364_v38 }
  0x66   :  { %v339_v56 = vand.u32 2147483647, %v338_v42  ;;  %v433_v27 = vpop.eup %432 }
  0x67   :  { %v435_v37 = vpop.eup %434  ;;  %v255_v10 = vxor.u32 2147483648, %v433_v27 }
  0x68   :  { %v342_v60 = vmul.f32 %v341_v53, %v339_v56  ;;  %v437_v43 = vpop.eup %436  ;;  %v252_v51 = vxor.u32 2147483648, %v435_v37 }
  0x69   :  { %v439_v12 = vpop.eup %438  ;;  %v153_v29 = vmul.f32 0.6931472, %v437_v43  ;;  %v256_v14 = vsel %vm254_vm5, %v255_v10, %v435_v37 }
  0x6a   :  { %v343_v62 = vxor.u32 2147483648, %v342_v60  ;;  %v441_v28 = vpop.eup %440  ;;  %v135_v34 = vadd.f32 %v439_v12, %v134_v9  ;;  %v253_v35 = vsel %vm251_vm4, %v433_v27, %v252_v51 }
  0x6b   :  { %v154_v26 = vsub.f32 %v441_v28, %v153_v29  ;;  %v257_v24 = vsel %vm250_vm6, %v253_v35, %v256_v14 }
  0x6c   :  { %v344_v5 = vsel %vm261_vm1, %v343_v62, %v342_v60  ;;  %v258_v41 = vsel %vm247_vm7, nan, %v257_v24 }
  0x6d   :  { %v347_v18 = vsel %vm717_vm2, %v543_v17, %v344_v5  ;;  %v367_v47 = vmul.f32 %v431_v6, %v154_v26 }
  0x6e   :  { %442 = vcosq.f32 %v347_v18 }
  0x6f   :  { %444 = vsinq.f32 %v347_v18  ;;  %v368_v45 = vadd.f32 %v367_v47, %v366_v46 }
  0x70   :  { %446 = vrcp.f32 %v135_v34 }
  0x78   :  { %v443_v20 = vpop.eup %442 }
  0x79   :  { %v445_v31 = vpop.eup %444  ;;  %v358_v39 = vxor.u32 2147483648, %v443_v20 }
  0x7a   :  { %v355_v3 = vxor.u32 2147483648, %v445_v31  ;;  %v447_v49 = vpop.eup %446 }
  0x7b   :  { %v359_v4 = vsel %vm357_vm8, %v358_v39, %v445_v31 }
  0x7c   :  { %v356_v44 = vsel %vm354_vm9, %v443_v20, %v355_v3 }
  0x7d   :  { %v360_v30 = vsel %vm353_vm10, %v356_v44, %v359_v4 }
  0x7e   :  { %v361_v48 = vsel %vm351_vm11, nan, %v360_v30 }
  0x7f   :  { %v362_v0 = vadd.f32 %v361_v48, %v258_v41 }
  0x81   :  { %v363_v23 = vsub.f32 0.0, %v362_v0 }
  0x83   :  { %v369_v36 = vmul.f32 %v439_v12, %v363_v23 }
  0x85   :  { %v370_v50 = vadd.f32 %v369_v36, %v368_v45 }
  0x87   :  { %v371_v52 = vmul.f32 %v447_v49, %v370_v50 }
  0x89   :  { %372 = vst [vmem:[%s745_s3] sm:$0xff] %v371_v52 }
  0x8a   :  { %377 = vsyncpa [#allocation3], 1 }
  0x8b   :  { %378 = vsyncpa [#allocation5], 1 }

</bundles_post_ra>
